<compile_context>
chip_gen: v5e
topology: v5e:2x2
jax: 0.10.0
libtpu: 0.0.40
codegen_flags: <defaults>
</compile_context>

<pallas_src>
import jax
import jax.numpy as jnp
from jax.experimental import pallas as pl
from jax.experimental.pallas import tpu as pltpu


def _round_up(x, m):
    return ((x + m - 1) // m) * m


def _probcal_kernel(a_ref, b_ref, x_ref, w_ref, bias_ref, o_ref, acc_ref):
    k = pl.program_id(1)

    @pl.when(k == 0)
    def _():
        acc_ref[...] = jnp.zeros_like(acc_ref)

    # Inner K loop: pure MXU accumulate (bf16 inputs, f32 accumulation).
    acc_ref[...] += jnp.dot(
        x_ref[...], w_ref[...], preferred_element_type=jnp.float32
    )

    @pl.when(k == pl.num_programs(1) - 1)
    def _():
        # Epilogue: frozen-model bias + learned affine calibration, all in f32.
        a = a_ref[0]
        b = b_ref[0]
        o_ref[...] = ((acc_ref[...] + bias_ref[...]) * a + b).astype(o_ref.dtype)


def probcal_forward(x_nchw, w, bias, a, b, *, tm=None, tk=1024):
    """x_nchw: [B,C,H,W] f32; w: [D,NC] f32; bias: [1,NC] f32; a,b: [1] f32."""
    B = x_nchw.shape[0]
    D = x_nchw.shape[1] * x_nchw.shape[2] * x_nchw.shape[3]
    NC = w.shape[1]
    LANE = 128

    # --- padded / tiled geometry -------------------------------------------
    # M tile: sublane-aligned; caps at 256 to match the v6e/v7x 256-wide MXU.
    if tm is None:
        tm = min(256, _round_up(B, 8))
    M_pad = _round_up(B, tm)

    # K tile: 2*(tm*tk + tk*N_pad) bf16 double-buffers stay well under VMEM.
    D_pad = _round_up(D, LANE)
    tk = min(tk, D_pad)
    D_pad = _round_up(D_pad, tk)

    # Lane-dense output: pad NC up to a full 128-lane tile.
    N_pad = _round_up(NC, LANE)

    # --- glue: flatten / pad / cast in plain JAX ---------------------------
    x_p = x_nchw.reshape(B, D).astype(jnp.bfloat16)
    if (M_pad, D_pad) != (B, D):
        x_p = jnp.zeros((M_pad, D_pad), jnp.bfloat16).at[:B, :D].set(x_p)

    w_p = w.astype(jnp.bfloat16)
    if (D_pad, N_pad) != (D, NC):
        w_p = jnp.zeros((D_pad, N_pad), jnp.bfloat16).at[:D, :NC].set(w_p)

    bias_p = bias.astype(jnp.float32)
    if N_pad != NC:
        bias_p = jnp.zeros((1, N_pad), jnp.float32).at[:, :NC].set(bias_p)

    gm = M_pad // tm
    gk = D_pad // tk

    cost = pl.CostEstimate(
        flops=2 * M_pad * D_pad * N_pad,
        transcendentals=0,
        bytes_accessed=(M_pad * D_pad * 2 + D_pad * N_pad * 2 + M_pad * N_pad * 4),
    )

    out_pad = pl.pallas_call(
        _probcal_kernel,
        out_shape=jax.ShapeDtypeStruct((M_pad, N_pad), jnp.float32),
        grid_spec=pltpu.PrefetchScalarGridSpec(
            num_scalar_prefetch=0,
            grid=(gm, gk),
            in_specs=[
                pl.BlockSpec(memory_space=pltpu.SMEM),            # a (1,)
                pl.BlockSpec(memory_space=pltpu.SMEM),            # b (1,)
                pl.BlockSpec((tm, tk), lambda i, k: (i, k)),      # x  tile
                pl.BlockSpec((tk, N_pad), lambda i, k: (k, 0)),   # W  tile
                pl.BlockSpec((1, N_pad), lambda i, k: (0, 0)),    # bias
            ],
            out_specs=pl.BlockSpec((tm, N_pad), lambda i, k: (i, 0)),
            scratch_shapes=[pltpu.VMEM((tm, N_pad), jnp.float32)],
        ),
        compiler_params=pltpu.CompilerParams(
            dimension_semantics=("parallel", "arbitrary"),
        ),
        cost_estimate=cost,
    )(a, b, x_p, w_p, bias_p)

    # Slice the padded rows / lanes back to the logical result.
    return out_pad[:B, :NC]


if __name__ == "__main__":
    key = jax.random.PRNGKey(0)
    k_x, k_w = jax.random.split(key)

    # Small shapes consistent with an NCHW image-classifier input.
    B, C, H, W_dim = 2, 4, 16, 16
    NUM_CLASSES = 8
    D = C * H * W_dim

    x = jax.random.normal(k_x, (B, C, H, W_dim), dtype=jnp.float32)

    # Deterministic frozen backbone parameters.
    w = jax.random.normal(k_w, (D, NUM_CLASSES), dtype=jnp.float32) * (
        1.0 / jnp.sqrt(D)
    )
    bias = jnp.zeros((1, NUM_CLASSES), dtype=jnp.float32)

    # Calibration parameters exactly as in ProbCalModel.__init__.
    a = jnp.ones((1,), dtype=jnp.float32)
    b = jnp.zeros((1,), dtype=jnp.float32)

    out = probcal_forward(x, w, bias, a, b)
    jax.block_until_ready(out)

    # Pure-JAX reference (bf16-consistent, since the kernel feeds bf16 to the MXU).
    xb = x.reshape(B, D).astype(jnp.bfloat16).astype(jnp.float32)
    wb = w.astype(jnp.bfloat16).astype(jnp.float32)
    ref = (xb @ wb + bias) * a[0] + b[0]

    assert out.shape == (B, NUM_CLASSES)
    assert jnp.allclose(out, ref, atol=1e-3, rtol=1e-3)

    print("KERNEL_OK")
</pallas_src>

<mosaic_0001>
module attributes {stable_mosaic.version = 11 : i64} {
  func.func @_probcal_kernel(%arg0: i32, %arg1: i32, %arg2: memref<1xf32, #tpu.memory_space<smem>>, %arg3: memref<1xf32, #tpu.memory_space<smem>>, %arg4: memref<8x1024xbf16, #tpu.memory_space<vmem>>, %arg5: memref<1024x128xbf16, #tpu.memory_space<vmem>>, %arg6: memref<1x128xf32, #tpu.memory_space<vmem>>, %arg7: memref<8x128xf32, #tpu.memory_space<vmem>>, %arg8: memref<8x128xf32, #tpu.memory_space<vmem>>) attributes {dimension_semantics = [#tpu.dimension_semantics<parallel>, #tpu.dimension_semantics<arbitrary>], iteration_bounds = array<i64: 1, 1>, scalar_prefetch = 0 : i64, scratch_operands = 1 : i64, tpu.core_type = #tpu.core_type<tc>, window_params = [{transform_indices = @transform_0, window_bounds = array<i64: 1>}, {transform_indices = @transform_1, window_bounds = array<i64: 1>}, {transform_indices = @transform_2, window_bounds = array<i64: 8, 1024>}, {transform_indices = @transform_3, window_bounds = array<i64: 1024, 128>}, {pipeline_mode = #tpu.pipeline_mode<synchronous>, transform_indices = @transform_4, window_bounds = array<i64: 1, 128>}, {transform_indices = @transform_5, window_bounds = array<i64: 8, 128>}]} {
    %c0_i32 = arith.constant 0 : i32
    %0 = arith.cmpi eq, %arg1, %c0_i32 : i32
    %1 = arith.extui %0 : i1 to i32
    %c0_i32_0 = arith.constant 0 : i32
    %2 = arith.cmpi ne, %1, %c0_i32_0 : i32
    scf.if %2 {
      %cst_10 = arith.constant 0.000000e+00 : f32
      %12 = vector.broadcast %cst_10 : f32 to vector<8x128xf32>
      %c0_11 = arith.constant 0 : index
      %c0_12 = arith.constant 0 : index
      %13 = vector.load %arg8[%c0_11, %c0_12] : memref<8x128xf32, #tpu.memory_space<vmem>>, vector<8x128xf32>
      tpu.vector_store %arg8[%c0_11, %c0_12], %12 {strides = array<i32>} : memref<8x128xf32, #tpu.memory_space<vmem>>, vector<8x128xf32>,
    } else {
    }
    %c0 = arith.constant 0 : index
    %c0_1 = arith.constant 0 : index
    %3 = vector.load %arg8[%c0, %c0_1] : memref<8x128xf32, #tpu.memory_space<vmem>>, vector<8x128xf32>
    %c0_2 = arith.constant 0 : index
    %c0_3 = arith.constant 0 : index
    %4 = vector.load %arg4[%c0_2, %c0_3] : memref<8x1024xbf16, #tpu.memory_space<vmem>>, vector<8x1024xbf16>
    %c0_4 = arith.constant 0 : index
    %c0_5 = arith.constant 0 : index
    %5 = vector.load %arg5[%c0_4, %c0_5] : memref<1024x128xbf16, #tpu.memory_space<vmem>>, vector<1024x128xbf16>
    %cst = arith.constant dense<0.000000e+00> : vector<8x128xf32>
    %6 = tpu.matmul %4, %5, %cst {dimension_numbers = #tpu.dot_dimension_numbers<[1], [0], [0], [1], [0, 0, 1, 1], [], []>} : vector<8x1024xbf16>, vector<1024x128xbf16>, vector<8x128xf32> -> vector<8x128xf32>
    %7 = arith.addf %3, %6 : vector<8x128xf32>
    %c0_6 = arith.constant 0 : index
    %c0_7 = arith.constant 0 : index
    %8 = vector.load %arg8[%c0_6, %c0_7] : memref<8x128xf32, #tpu.memory_space<vmem>>, vector<8x128xf32>
    tpu.vector_store %arg8[%c0_6, %c0_7], %7 {strides = array<i32>} : memref<8x128xf32, #tpu.memory_space<vmem>>, vector<8x128xf32>,
    %c0_i32_8 = arith.constant 0 : i32
    %9 = arith.cmpi eq, %arg1, %c0_i32_8 : i32
    %10 = arith.extui %9 : i1 to i32
    %c0_i32_9 = arith.constant 0 : i32
    %11 = arith.cmpi ne, %10, %c0_i32_9 : i32
    scf.if %11 {
      %c0_10 = arith.constant 0 : index
      %12 = memref.load %arg2[%c0_10] : memref<1xf32, #tpu.memory_space<smem>>
      %c0_11 = arith.constant 0 : index
      %13 = memref.load %arg3[%c0_11] : memref<1xf32, #tpu.memory_space<smem>>
      %c0_12 = arith.constant 0 : index
      %c0_13 = arith.constant 0 : index
      %14 = vector.load %arg8[%c0_12, %c0_13] : memref<8x128xf32, #tpu.memory_space<vmem>>, vector<8x128xf32>
      %c0_14 = arith.constant 0 : index
      %c0_15 = arith.constant 0 : index
      %15 = vector.load %arg6[%c0_14, %c0_15] : memref<1x128xf32, #tpu.memory_space<vmem>>, vector<1x128xf32>
      %16 = vector.broadcast %15 : vector<1x128xf32> to vector<8x128xf32>
      %17 = arith.addf %14, %16 : vector<8x128xf32>
      %18 = vector.broadcast %12 : f32 to vector<8x128xf32>
      %19 = arith.mulf %17, %18 : vector<8x128xf32>
      %20 = vector.broadcast %13 : f32 to vector<8x128xf32>
      %21 = arith.addf %19, %20 : vector<8x128xf32>
      %c0_16 = arith.constant 0 : index
      %c0_17 = arith.constant 0 : index
      %22 = vector.load %arg7[%c0_16, %c0_17] : memref<8x128xf32, #tpu.memory_space<vmem>>, vector<8x128xf32>
      tpu.vector_store %arg7[%c0_16, %c0_17], %21 {strides = array<i32>} : memref<8x128xf32, #tpu.memory_space<vmem>>, vector<8x128xf32>,
    } else {
    }
    return
  }
  func.func @transform_0(%arg0: i32, %arg1: i32) -> i32 {
    %c0_i32 = arith.constant 0 : i32
    %c0_i32_0 = arith.constant 0 : i32
    return %c0_i32 : i32
  }
  func.func @transform_1(%arg0: i32, %arg1: i32) -> i32 {
    %c0_i32 = arith.constant 0 : i32
    %c0_i32_0 = arith.constant 0 : i32
    return %c0_i32 : i32
  }
  func.func @transform_2(%arg0: i32, %arg1: i32) -> (i32, i32) {
    %c0_i32 = arith.constant 0 : i32
    return %arg0, %arg1 : i32, i32
  }
  func.func @transform_3(%arg0: i32, %arg1: i32) -> (i32, i32) {
    %c0_i32 = arith.constant 0 : i32
    %c0_i32_0 = arith.constant 0 : i32
    return %arg1, %c0_i32 : i32, i32
  }
  func.func @transform_4(%arg0: i32, %arg1: i32) -> (i32, i32) {
    %c0_i32 = arith.constant 0 : i32
    %c0_i32_0 = arith.constant 0 : i32
    %c0_i32_1 = arith.constant 0 : i32
    return %c0_i32, %c0_i32_0 : i32, i32
  }
  func.func @transform_5(%arg0: i32, %arg1: i32) -> (i32, i32) {
    %c0_i32 = arith.constant 0 : i32
    %c0_i32_0 = arith.constant 0 : i32
    return %arg0, %c0_i32 : i32, i32
  }
}

</mosaic_0001>

<bundles_post_ra>
// kernel: tpu_custom_call.1
= control target key start
LH: loop header
LB: loop body
LE: loop exit
PB: predicated region body
PF: predicated region fallthrough
CT: control target
= control target key end

     0   :  { %12 = vsyncpa [#allocation6], 0  ;;  %s1200_s0 = inlined_call_operand.<no memory space> [shape: f32[1], index: 0, kind: input, shape index: {}]   ;;  %s1201_s1 = inlined_call_operand.<no memory space> [shape: f32[1], index: 1, kind: input, shape index: {}]   ;;  %s1202_s2 = inlined_call_operand.hbm [shape: bf16[8,1024], index: 2, kind: input, shape index: {}]   ;;  %s1203_s3 = inlined_call_operand.hbm [shape: bf16[1024,128], index: 3, kind: input, shape index: {}]   ;;  %s1204_s4 = inlined_call_operand.vmem [shape: f32[1,128], index: 4, kind: input, shape index: {}]   ;;  %s1205_s5 = inlined_call_operand.hbm [shape: f32[8,128], index: 5, kind: output, shape index: {}]  }
   0x1   :  { %13 = vsyncpa [#allocation9], 0 }
   0x2   :  { %14 = vsyncpa [#allocation7], 0  ;;  %s24_s20 = sshll.u32 %s1202_s2, 4  ;;  %s1147_s21 = smov [#allocation5]   ;;  %s25_s20 = int_to_ptr.hbm [resolvable:$true] %s24_s20 }
   0x3   :  { %s26_s22 = sshll.u32 %s1147_s21, 4  ;;  %s34_s25 = sshll.u32 %s1203_s3, 4  ;;  %s27_s22 = int_to_ptr.vmem [resolvable:$true] %s26_s22  ;;  %s35_s25 = int_to_ptr.hbm [resolvable:$true] %s34_s25 }
   0x4   :  { %29 = dma.hbm_to_vmem [thread:$0]  %s25_s20, 512, %s27_s22, [#allocation6]  }
   0x5   :  { %s1148_s26 = smov [#allocation8]   ;;  %s1149_s28 = smov 64  }
   0x6   :  { %s36_s27 = sshll.u32 %s1148_s26, 4  ;;  %s1150_s29 = smov 4   ;;  %s37_s27 = int_to_ptr.vmem [resolvable:$true] %s36_s27 }
   0x7   :  { %42 = dma.hbm_to_vmem [thread:$0]  %s35_s25, 8192, %s37_s27, [#allocation9], %s1149_s28, %s1149_s28, %s1150_s29  }
   0x8   :  { %1141 = dma.done.wait [#allocation6], 512  }
   0x9   :  { %1142 = vsyncadd [#allocation6], 4294966784 }
   0xa   :  { %1143 = dma.done.wait [#allocation9], 8192  }
   0xb   :  { %1144 = vsyncadd [#allocation9], 4294959104  ;;  %v1006_v0 = vld [vmem:[#allocation8 + $0x38] sm:$0xff]  ;;  %v1005_v4 = vld [vmem:[#allocation8 + $0x30] sm:$0xff]  ;;  %s1151_s9 = smov [#allocation10]   ;;  %s732_s13 = sshll.u32 %s1205_s5, 4  ;;  %s733_s13 = int_to_ptr.hbm [resolvable:$true] %s732_s13 }
   0xc   :  { %v1014_v1 = vld [vmem:[#allocation8 + $0x78] sm:$0xff]  ;;  %603 = vmatpush.bf16.msra.mxu0 %v1006_v0  ;;  %v1013_v5 = vld [vmem:[#allocation8 + $0x70] sm:$0xff]  ;;  %v1004_v8 = vld [vmem:[#allocation8 + $0x28] sm:$0xff]  ;;  %s730_s10 = sshll.u32 %s1151_s9, 4  ;;  %s731_s10 = int_to_ptr.vmem [resolvable:$true] %s730_s10 }
   0xd   :  { %v1022_v2 = vld [vmem:[#allocation8 + $0xb8] sm:$0xff]  ;;  %616 = vmatpush.bf16.msra.mxu1 %v1014_v1  ;;  %v1021_v6 = vld [vmem:[#allocation8 + $0xb0] sm:$0xff]  ;;  %v1012_v9 = vld [vmem:[#allocation8 + $0x68] sm:$0xff] }
   0xe   :  { %v1030_v3 = vld [vmem:[#allocation8 + $0xf8] sm:$0xff]  ;;  %629 = vmatpush.bf16.msra.mxu2 %v1022_v2  ;;  %v1029_v7 = vld [vmem:[#allocation8 + $0xf0] sm:$0xff]  ;;  %v1020_v10 = vld [vmem:[#allocation8 + $0xa8] sm:$0xff] }
   0xf   :  { %642 = vmatpush.bf16.msra.mxu3 %v1030_v3  ;;  %v1028_v11 = vld [vmem:[#allocation8 + $0xe8] sm:$0xff]  ;;  %v1003_v12 = vld [vmem:[#allocation8 + $0x20] sm:$0xff]  ;;  %v1002_v16 = vld [vmem:[#allocation8 + $0x18] sm:$0xff] }
  0x10   :  { %604 = vmatpush.bf16.msra.mxu0 %v1005_v4  ;;  %v1011_v13 = vld [vmem:[#allocation8 + $0x60] sm:$0xff]  ;;  %v1010_v17 = vld [vmem:[#allocation8 + $0x58] sm:$0xff]  ;;  %v1001_v20 = vld [vmem:[#allocation8 + $0x10] sm:$0xff] }
  0x11   :  { %617 = vmatpush.bf16.msra.mxu1 %v1013_v5  ;;  %v1019_v14 = vld [vmem:[#allocation8 + $0xa0] sm:$0xff]  ;;  %v1018_v18 = vld [vmem:[#allocation8 + $0x98] sm:$0xff]  ;;  %v1009_v21 = vld [vmem:[#allocation8 + $0x50] sm:$0xff] }
  0x12   :  { %630 = vmatpush.bf16.msra.mxu2 %v1021_v6  ;;  %v1027_v15 = vld [vmem:[#allocation8 + $0xe0] sm:$0xff]  ;;  %v1026_v19 = vld [vmem:[#allocation8 + $0xd8] sm:$0xff]  ;;  %v1017_v22 = vld [vmem:[#allocation8 + $0x90] sm:$0xff] }
  0x13   :  { %643 = vmatpush.bf16.msra.mxu3 %v1029_v7  ;;  %v1025_v23 = vld [vmem:[#allocation8 + $0xd0] sm:$0xff]  ;;  %v1000_v24 = vld [vmem:[#allocation8 + $0x8] sm:$0xff]  ;;  %v59_v29 = vld [vmem:[#allocation5] sm:$0xff] }
  0x14   :  { %605 = vmatpush.bf16.msra.mxu0 %v1004_v8  ;;  %v1008_v25 = vld [vmem:[#allocation8 + $0x48] sm:$0xff]  ;;  %v999_v30 = vld [vmem:[#allocation8] sm:$0xff]  ;;  %v195_v33 = vunpack.c.l.b16 %v59_v29  ;;  %v196_v37 = vunpack.c.h.b16 %v59_v29  ;;  %v1038_v38 = vld [vmem:[#allocation8 + $0x138] sm:$0xff] }
  0x15   :  { %618 = vmatpush.bf16.msra.mxu1 %v1012_v9  ;;  %v1016_v26 = vld [vmem:[#allocation8 + $0x88] sm:$0xff]  ;;  %v1007_v31 = vld [vmem:[#allocation8 + $0x40] sm:$0xff]  ;;  %v1046_v39 = vld [vmem:[#allocation8 + $0x178] sm:$0xff] }
  0x16   :  { %631 = vmatpush.bf16.msra.mxu2 %v1020_v10  ;;  %v1024_v27 = vld [vmem:[#allocation8 + $0xc8] sm:$0xff]  ;;  %v1015_v34 = vld [vmem:[#allocation8 + $0x80] sm:$0xff]  ;;  %v1054_v40 = vld [vmem:[#allocation8 + $0x1b8] sm:$0xff]  ;;  %v203_v43 = vpack.c.b16 %v195_v33, %v195_v33  ;;  %v204_v45 = vpack.c.b16 %v196_v37, %v196_v37 }
  0x17   :  { %644 = vmatpush.bf16.msra.mxu3 %v1028_v11  ;;  %v60_v28 = vld [vmem:[#allocation5 + $0x8] sm:$0xff]  ;;  %v1023_v35 = vld [vmem:[#allocation8 + $0xc0] sm:$0xff]  ;;  %v1062_v41 = vld [vmem:[#allocation8 + $0x1f8] sm:$0xff] }
  0x18   :  { %606 = vmatpush.bf16.msra.mxu0 %v1003_v12  ;;  %v197_v32 = vunpack.c.l.b16 %v60_v28  ;;  %v198_v36 = vunpack.c.h.b16 %v60_v28  ;;  %v1037_v46 = vld [vmem:[#allocation8 + $0x130] sm:$0xff]  ;;  %v1036_v50 = vld [vmem:[#allocation8 + $0x128] sm:$0xff]  ;;  %v1035_v54 = vld [vmem:[#allocation8 + $0x120] sm:$0xff] }
  0x19   :  { %619 = vmatpush.bf16.msra.mxu1 %v1011_v13  ;;  %v1045_v47 = vld [vmem:[#allocation8 + $0x170] sm:$0xff]  ;;  %v1044_v51 = vld [vmem:[#allocation8 + $0x168] sm:$0xff]  ;;  %v1043_v55 = vld [vmem:[#allocation8 + $0x160] sm:$0xff] }
  0x1a   :  { %632 = vmatpush.bf16.msra.mxu2 %v1019_v14  ;;  %v205_v42 = vpack.c.b16 %v197_v32, %v197_v32  ;;  %v206_v44 = vpack.c.b16 %v198_v36, %v198_v36  ;;  %v1053_v48 = vld [vmem:[#allocation8 + $0x1b0] sm:$0xff]  ;;  %v1052_v52 = vld [vmem:[#allocation8 + $0x1a8] sm:$0xff]  ;;  %v1051_v56 = vld [vmem:[#allocation8 + $0x1a0] sm:$0xff] }
  0x1b   :  { %645 = vmatpush.bf16.msra.mxu3 %v1027_v15  ;;  %v1061_v49 = vld [vmem:[#allocation8 + $0x1f0] sm:$0xff]  ;;  %v1060_v53 = vld [vmem:[#allocation8 + $0x1e8] sm:$0xff]  ;;  %v1059_v57 = vld [vmem:[#allocation8 + $0x1e0] sm:$0xff] }
  0x1c   :  { %607 = vmatpush.bf16.msra.mxu0 %v1002_v16  ;;  %v1034_v58 = vld [vmem:[#allocation8 + $0x118] sm:$0xff]  ;;  %v1033_v62 = vld [vmem:[#allocation8 + $0x110] sm:$0xff]  ;;  %v1032_v2 = vld [vmem:[#allocation8 + $0x108] sm:$0xff] }
  0x1d   :  { %620 = vmatpush.bf16.msra.mxu1 %v1010_v17  ;;  %v1042_v59 = vld [vmem:[#allocation8 + $0x158] sm:$0xff]  ;;  %v1041_v63 = vld [vmem:[#allocation8 + $0x150] sm:$0xff]  ;;  %v1040_v3 = vld [vmem:[#allocation8 + $0x148] sm:$0xff] }
  0x1e   :  { %633 = vmatpush.bf16.msra.mxu2 %v1018_v18  ;;  %v1050_v60 = vld [vmem:[#allocation8 + $0x198] sm:$0xff]  ;;  %v1049_v0 = vld [vmem:[#allocation8 + $0x190] sm:$0xff]  ;;  %v1048_v5 = vld [vmem:[#allocation8 + $0x188] sm:$0xff] }
  0x1f   :  { %646 = vmatpush.bf16.msra.mxu3 %v1026_v19  ;;  %v1058_v61 = vld [vmem:[#allocation8 + $0x1d8] sm:$0xff]  ;;  %v1057_v1 = vld [vmem:[#allocation8 + $0x1d0] sm:$0xff]  ;;  %v1056_v6 = vld [vmem:[#allocation8 + $0x1c8] sm:$0xff] }
  0x20   :  { %608 = vmatpush.bf16.msra.mxu0 %v1001_v20  ;;  %v61_v4 = vld [vmem:[#allocation5 + $0x10] sm:$0xff]  ;;  %v62_v7 = vld [vmem:[#allocation5 + $0x18] sm:$0xff]  ;;  %v1031_v10 = vld [vmem:[#allocation8 + $0x100] sm:$0xff] }
  0x21   :  { %621 = vmatpush.bf16.msra.mxu1 %v1009_v21  ;;  %v199_v8 = vunpack.c.l.b16 %v61_v4  ;;  %v200_v9 = vunpack.c.h.b16 %v61_v4  ;;  %v1039_v11 = vld [vmem:[#allocation8 + $0x140] sm:$0xff]  ;;  %v201_v12 = vunpack.c.l.b16 %v62_v7  ;;  %v202_v13 = vunpack.c.h.b16 %v62_v7 }
  0x22   :  { %634 = vmatpush.bf16.msra.mxu2 %v1017_v22  ;;  %v1047_v14 = vld [vmem:[#allocation8 + $0x180] sm:$0xff] }
  0x23   :  { %647 = vmatpush.bf16.msra.mxu3 %v1025_v23  ;;  %v1055_v15 = vld [vmem:[#allocation8 + $0x1c0] sm:$0xff]  ;;  %v207_v16 = vpack.c.b16 %v199_v8, %v199_v8  ;;  %v208_v17 = vpack.c.b16 %v200_v9, %v200_v9  ;;  %v209_v18 = vpack.c.b16 %v201_v12, %v201_v12  ;;  %v210_v19 = vpack.c.b16 %v202_v13, %v202_v13 }
  0x24   :  { %609 = vmatpush.bf16.msra.mxu0 %v1000_v24 }
  0x25   :  { %622 = vmatpush.bf16.msra.mxu1 %v1008_v25 }
  0x26   :  { %635 = vmatpush.bf16.msra.mxu2 %v1016_v26 }
  0x27   :  { %648 = vmatpush.bf16.msra.mxu3 %v1024_v27 }
  0x28   :  { %610 = vmatpush.bf16.msra.mxu0 %v999_v30 }
  0x29   :  { %623 = vmatpush.bf16.msra.mxu1 %v1007_v31 }
  0x2a   :  { %636 = vmatpush.bf16.msra.mxu2 %v1015_v34 }
  0x2b   :  { %649 = vmatpush.bf16.msra.mxu3 %v1023_v35  ;;  %611 = vmatmul.bf16.vlgmr.msra.gmra.mxu0 %v203_v43 }
  0x2c   :  { %655 = vmatpush.bf16.msrb.mxu0 %v1038_v38  ;;  %624 = vmatmul.bf16.vlgmr.msra.gmra.mxu1 %v204_v45  ;;  %v1068_v38 = vld [vmem:[%s1204_s4] ss:$0 sm:$0xff] }
  0x2d   :  { %668 = vmatpush.bf16.msrb.mxu1 %v1046_v39  ;;  %637 = vmatmul.bf16.vlgmr.msra.gmra.mxu2 %v205_v42  ;;  %v720_v42 = vstv %s1200_s0 }
  0x2e   :  { %681 = vmatpush.bf16.msrb.mxu2 %v1054_v40  ;;  %650 = vmatmul.bf16.vlgmr.msra.gmra.mxu3 %v206_v44  ;;  %v722_v44 = vstv %s1201_s1 }
  0x2f   :  { %694 = vmatpush.bf16.msrb.mxu3 %v1062_v41 }
  0x30   :  { %656 = vmatpush.bf16.msrb.mxu0 %v1037_v46 }
  0x31   :  { %669 = vmatpush.bf16.msrb.mxu1 %v1045_v47 }
  0x32   :  { %682 = vmatpush.bf16.msrb.mxu2 %v1053_v48 }
  0x33   :  { %695 = vmatpush.bf16.msrb.mxu3 %v1061_v49 }
  0x34   :  { %657 = vmatpush.bf16.msrb.mxu0 %v1036_v50 }
  0x35   :  { %670 = vmatpush.bf16.msrb.mxu1 %v1044_v51 }
  0x36   :  { %683 = vmatpush.bf16.msrb.mxu2 %v1052_v52 }
  0x37   :  { %696 = vmatpush.bf16.msrb.mxu3 %v1060_v53 }
  0x38   :  { %658 = vmatpush.bf16.msrb.mxu0 %v1035_v54 }
  0x39   :  { %671 = vmatpush.bf16.msrb.mxu1 %v1043_v55 }
  0x3a   :  { %684 = vmatpush.bf16.msrb.mxu2 %v1051_v56 }
  0x3b   :  { %697 = vmatpush.bf16.msrb.mxu3 %v1059_v57 }
  0x3c   :  { %659 = vmatpush.bf16.msrb.mxu0 %v1034_v58 }
  0x3d   :  { %672 = vmatpush.bf16.msrb.mxu1 %v1042_v59 }
  0x3e   :  { %685 = vmatpush.bf16.msrb.mxu2 %v1050_v60 }
  0x3f   :  { %698 = vmatpush.bf16.msrb.mxu3 %v1058_v61 }
  0x40   :  { %660 = vmatpush.bf16.msrb.mxu0 %v1033_v62 }
  0x41   :  { %673 = vmatpush.bf16.msrb.mxu1 %v1041_v63 }
  0x42   :  { %686 = vmatpush.bf16.msrb.mxu2 %v1049_v0 }
  0x43   :  { %699 = vmatpush.bf16.msrb.mxu3 %v1057_v1 }
  0x44   :  { %661 = vmatpush.bf16.msrb.mxu0 %v1032_v2 }
  0x45   :  { %674 = vmatpush.bf16.msrb.mxu1 %v1040_v3 }
  0x46   :  { %687 = vmatpush.bf16.msrb.mxu2 %v1048_v5 }
  0x47   :  { %700 = vmatpush.bf16.msrb.mxu3 %v1056_v6 }
  0x48   :  { %662 = vmatpush.bf16.msrb.mxu0 %v1031_v10 }
  0x49   :  { %675 = vmatpush.bf16.msrb.mxu1 %v1039_v11 }
  0x4a   :  { %688 = vmatpush.bf16.msrb.mxu2 %v1047_v14 }
  0x4b   :  { %701 = vmatpush.bf16.msrb.mxu3 %v1055_v15  ;;  %663 = vmatmul.bf16.vlgmr.msrb.gmra.mxu0 %v207_v16 }
  0x4c   :  { %676 = vmatmul.bf16.vlgmr.msrb.gmra.mxu1 %v208_v17 }
  0x4d   :  { %689 = vmatmul.bf16.vlgmr.msrb.gmra.mxu2 %v209_v18 }
  0x4e   :  { %702 = vmatmul.bf16.vlgmr.msrb.gmra.mxu3 %v210_v19 }
  0xa8   :  { %v612_v20 = vpop.f32.mrf.mxu0 }
  0xa9   :  { %v625_v21 = vpop.f32.mrf.mxu1 }
  0xaa   :  { %v626_v28 = vadd.f32 %v625_v21, %v612_v20 }
  0xb0   :  { %v638_v22 = vpop.f32.mrf.mxu2  ;;  %v614_v24 = vpop.f32.mrf.mxu0 }
  0xb1   :  { %v651_v23 = vpop.f32.mrf.mxu3  ;;  %v627_v25 = vpop.f32.mrf.mxu1  ;;  %v639_v29 = vadd.f32 %v638_v22, %v626_v28 }
  0xb3   :  { %v652_v30 = vadd.f32 %v651_v23, %v639_v29 }
  0xb8   :  { %v640_v26 = vpop.f32.mrf.mxu2 }
  0xb9   :  { %v653_v27 = vpop.f32.mrf.mxu3 }
  0xc8   :  { %v664_v31 = vpop.f32.mrf.mxu0 }
  0xc9   :  { %v677_v32 = vpop.f32.mrf.mxu1  ;;  %v665_v33 = vadd.f32 %v664_v31, %v652_v30 }
  0xcb   :  { %v678_v34 = vadd.f32 %v677_v32, %v665_v33 }
  0xd0   :  { %v690_v35 = vpop.f32.mrf.mxu2  ;;  %v666_v39 = vpop.f32.mrf.mxu0 }
  0xd1   :  { %v703_v36 = vpop.f32.mrf.mxu3  ;;  %v691_v37 = vadd.f32 %v690_v35, %v678_v34  ;;  %v679_v40 = vpop.f32.mrf.mxu1 }
  0xd3   :  { %v704_v41 = vadd.f32 %v703_v36, %v691_v37 }
  0xd5   :  { %v719_v43 = vadd.f32 %v1068_v38, %v704_v41 }
  0xd7   :  { %v721_v45 = vmul.f32 %v720_v42, %v719_v43 }
  0xd8   :  { %v692_v46 = vpop.f32.mrf.mxu2 }
  0xd9   :  { %v705_v47 = vpop.f32.mrf.mxu3  ;;  %v723_v48 = vadd.f32 %v722_v44, %v721_v45 }
  0xdb   :  { %724 = vst [vmem:[#allocation10] sm:$0xff] %v723_v48 }
  0xdc   :  { %735 = dma.vmem_to_hbm [thread:$0]  %s731_s10, 128, %s733_s13, [#allocation7]  }
  0xdd   :  { %1145 = dma.done.wait [#allocation7], 128  }
  0xde   :  { %1146 = vsyncadd [#allocation7], 4294967168 }
  0xdf   :  { %740 = vsyncpa [#allocation6], 1 }
  0xe0   :  { %741 = vsyncpa [#allocation9], 1 }
  0xe1   :  { %742 = vsyncpa [#allocation7], 1 }

</bundles_post_ra>
